<compile_context>
chip_gen: v5e
topology: v5e:2x2
jax: 0.10.0
libtpu: 0.0.40
codegen_flags: <defaults>
</compile_context>

<pallas_src>
import jax
import jax.numpy as jnp
from jax import lax
from jax.experimental import pallas as pl
from jax.experimental.pallas import tpu as pltpu


def _round_up(a: int, b: int) -> int:
    return -(-a // b) * b


def _vmem_capacity_bytes() -> int:
    """Best-effort physical VMEM capacity for the current TPU generation."""
    try:
        return int(pltpu.get_tpu_info().vmem_capacity_bytes)
    except Exception:
        kind = ""
        try:
            kind = jax.devices()[0].device_kind.lower()
        except Exception:
            pass
        if "v7" in kind:
            return 64 * 1024 * 1024
        return 128 * 1024 * 1024


def _l2_cost_kernel(x_ref, y_ref, xsq_ref, ysq_ref, c_ref):
    # x_ref:   (tm, tk) tile of x          (f32 or bf16)
    # y_ref:   (tn, tk) tile of y          (f32 or bf16)
    # xsq_ref: (tm, 1)  precomputed ||x||^2 rows  (f32)
    # ysq_ref: (1, tn)  precomputed ||y||^2 cols  (f32)
    # c_ref:   (tm, tn) output tile (f32), resident across the k axis.
    k = pl.program_id(2)
    nk = pl.num_programs(2)

    # Plain x.y^T partial product on the NT layout (no transposed y tile, no
    # per-step -2 scale); f32 accumulation on the MXU result path.
    prod = lax.dot_general(
        x_ref[...],
        y_ref[...],
        dimension_numbers=(((1,), (1,)), ((), ())),
        preferred_element_type=jnp.float32,
    )

    @pl.when(k == 0)
    def _():
        # Direct first write: no zero-fill + reload pass over the accumulator.
        c_ref[...] = prod

    @pl.when(k != 0)
    def _():
        c_ref[...] += prod

    @pl.when(k == nk - 1)
    def _():
        # Apply the -2 scale once per output tile, add the precomputed norms,
        # and clamp tiny negatives from the ||x||^2 + ||y||^2 - 2xy cancellation.
        c_ref[...] = jnp.maximum(
            xsq_ref[...] + ysq_ref[...] - 2.0 * c_ref[...], 0.0
        )


def l2_cost_matrix(x, y, *, tm=None, tn=None, tk=None, dot_in_bf16=False):
    """Pairwise squared-L2 cost matrix via a tiled Pallas kernel.

    Handles arbitrary N, M, D by zero-padding to tile multiples (zero rows /
    zero feature columns do not perturb the un-padded region, which is sliced
    out at the end).
    """
    N, D = x.shape
    M, Dy = y.shape
    assert D == Dy, "feature dims must match"

    x = x.astype(jnp.float32)
    y = y.astype(jnp.float32)

    # ---- per-generation VMEM budgets --------------------------------------
    vmem_cap = _vmem_capacity_bytes()
    small_vmem = vmem_cap <= 64 * 1024 * 1024        # v7x-class
    tile_budget = (40 if small_vmem else 80) * 1024 * 1024   # double-buffered tiles
    vmem_limit_cap = (48 if small_vmem else 100) * 1024 * 1024

    dot_bytes = 2 if dot_in_bf16 else 4

    # ---- tile sizes (HBM-bound on C writeback -> big lane-dense tiles) -----
    Dp128 = _round_up(D, 128)
    if tm is None:
        tm = min(1024, _round_up(N, 8))
    if tn is None:
        tn = min(2048, _round_up(M, 128))
    if tk is None:
        tk = min(Dp128, 1024)
    tm = _round_up(tm, 8)
    tn = _round_up(tn, 128)
    tk = _round_up(tk, 128)

    def tiles_bytes(tm_, tn_, tk_):
        xb = tm_ * tk_ * dot_bytes            # x tile
        yb = tn_ * tk_ * dot_bytes            # y tile
        xsqb = tm_ * 128 * 4                  # (tm,1) block, lane-padded
        ysqb = 8 * tn_ * 4                    # (1,tn) block, sublane-padded
        cb = tm_ * tn_ * 4                    # output tile
        return 2 * (xb + yb + xsqb + ysqb + cb)   # double-buffered

    # Shrink (tk first, then tn, then tm) until the estimate fits the budget.
    while tiles_bytes(tm, tn, tk) > tile_budget:
        if tk > 512:
            tk = _round_up(max(128, tk // 2), 128)
        elif tn > 256:
            tn = _round_up(max(128, tn // 2), 128)
        elif tm > 8:
            tm = _round_up(max(8, tm // 2), 8)
        else:
            break

    Np = _round_up(N, tm)
    Mp = _round_up(M, tn)
    Dp = _round_up(D, tk)

    # ---- padding (zeros are harmless for both the norms and the dot) -------
    x_p = jnp.pad(x, ((0, Np - N), (0, Dp - D)))
    y_p = jnp.pad(y, ((0, Mp - M), (0, Dp - D)))

    # Precompute squared norms once in f32 (O((N+M)*D), negligible vs O(N*M*D)).
    xsq = jnp.sum(x_p * x_p, axis=-1, keepdims=True)          # (Np, 1)
    ysq = jnp.sum(y_p * y_p, axis=-1, keepdims=True).T        # (1, Mp)

    if dot_in_bf16:
        # Halve operand HBM traffic and run the MXU in bf16 mode; f32 accum.
        x_p = x_p.astype(jnp.bfloat16)
        y_p = y_p.astype(jnp.bfloat16)

    grid = (Np // tm, Mp // tn, Dp // tk)

    est_vmem = tiles_bytes(tm, tn, tk)
    vmem_limit = int(min(max(32 * 1024 * 1024, est_vmem + 8 * 1024 * 1024),
                         vmem_limit_cap))
    vmem_limit = max(vmem_limit, est_vmem + 2 * 1024 * 1024)

    out = pl.pallas_call(
        _l2_cost_kernel,
        out_shape=jax.ShapeDtypeStruct((Np, Mp), jnp.float32),
        grid_spec=pltpu.PrefetchScalarGridSpec(
            num_scalar_prefetch=0,
            grid=grid,
            in_specs=[
                pl.BlockSpec((tm, tk), lambda i, j, k: (i, k)),   # x tile
                pl.BlockSpec((tn, tk), lambda i, j, k: (j, k)),   # y tile
                pl.BlockSpec((tm, 1), lambda i, j, k: (i, 0)),    # ||x||^2
                pl.BlockSpec((1, tn), lambda i, j, k: (0, j)),    # ||y||^2
            ],
            out_specs=pl.BlockSpec((tm, tn), lambda i, j, k: (i, j)),
        ),
        compiler_params=pltpu.CompilerParams(
            dimension_semantics=("parallel", "parallel", "arbitrary"),
            vmem_limit_bytes=vmem_limit,
        ),
    )(x_p, y_p, xsq, ysq)

    return out[:N, :M]


def base_wasserstein_forward(x, y, p=None, q=None, cost_type="L2",
                             dot_in_bf16=False):
    """JAX re-implementation of Base_Wasserstein.forward (up to the abstract
    forward_with_cost_matrix). Returns (C, p, q)."""
    if cost_type != "L2":
        raise NotImplementedError(f"The cost type {cost_type} is not implemented!")
    if p is None:
        p = jnp.ones((x.shape[0],), dtype=jnp.float32)
        p = p / jnp.sum(p)
    if q is None:
        q = jnp.ones((y.shape[0],), dtype=jnp.float32)
        q = q / jnp.sum(q)
    # data_precision='double' -> mapped to float32 on TPU (see TODO above)
    x = x.astype(jnp.float32)
    y = y.astype(jnp.float32)
    p = p.astype(jnp.float32)
    q = q.astype(jnp.float32)
    C = l2_cost_matrix(x, y, dot_in_bf16=dot_in_bf16)
    return C, p, q


if __name__ == "__main__":
    key = jax.random.PRNGKey(0)
    kx, ky = jax.random.split(key)

    # Non-tile-multiple M and small D exercise the padding / D-padding paths.
    N, M, D = 256, 160, 32
    x = jax.random.normal(kx, (N, D), dtype=jnp.float32)
    y = jax.random.normal(ky, (M, D), dtype=jnp.float32)

    C, p, q = base_wasserstein_forward(x, y)
    C = jax.block_until_ready(C)

    # Reference: direct broadcast-and-sum, matching the PyTorch semantics.
    C_ref = jnp.sum((x[:, None, :] - y[None, :, :]) ** 2, axis=-1)
    assert C.shape == (N, M)
    assert p.shape == (N,) and q.shape == (M,)
    assert jnp.allclose(jnp.sum(p), 1.0) and jnp.allclose(jnp.sum(q), 1.0)
    assert bool(jnp.all(C >= 0.0))
    assert jnp.allclose(C, C_ref, atol=1e-3, rtol=1e-4), float(
        jnp.max(jnp.abs(C - C_ref))
    )

    print("KERNEL_OK")
</pallas_src>

<mosaic_0001>
module attributes {stable_mosaic.version = 11 : i64} {
  func.func @_l2_cost_kernel(%arg0: i32, %arg1: i32, %arg2: i32, %arg3: memref<256x128xf32, #tpu.memory_space<vmem>>, %arg4: memref<256x128xf32, #tpu.memory_space<vmem>>, %arg5: memref<256x1xf32, #tpu.memory_space<vmem>>, %arg6: memref<1x256xf32, #tpu.memory_space<vmem>>, %arg7: memref<256x256xf32, #tpu.memory_space<vmem>>) attributes {dimension_semantics = [#tpu.dimension_semantics<parallel>, #tpu.dimension_semantics<parallel>, #tpu.dimension_semantics<arbitrary>], iteration_bounds = array<i64: 1, 1, 1>, scalar_prefetch = 0 : i64, scratch_operands = 0 : i64, tpu.core_type = #tpu.core_type<tc>, window_params = [{transform_indices = @transform_0, window_bounds = array<i64: 256, 128>}, {transform_indices = @transform_1, window_bounds = array<i64: 256, 128>}, {transform_indices = @transform_2, window_bounds = array<i64: 256, 1>}, {transform_indices = @transform_3, window_bounds = array<i64: 1, 256>}, {transform_indices = @transform_4, window_bounds = array<i64: 256, 256>}]} {
    %c0 = arith.constant 0 : index
    %c0_0 = arith.constant 0 : index
    %0 = vector.load %arg3[%c0, %c0_0] : memref<256x128xf32, #tpu.memory_space<vmem>>, vector<256x128xf32>
    %c0_1 = arith.constant 0 : index
    %c0_2 = arith.constant 0 : index
    %1 = vector.load %arg4[%c0_1, %c0_2] : memref<256x128xf32, #tpu.memory_space<vmem>>, vector<256x128xf32>
    %cst = arith.constant dense<0.000000e+00> : vector<256x256xf32>
    %2 = tpu.matmul %0, %1, %cst {dimension_numbers = #tpu.dot_dimension_numbers<[1], [1], [0], [0], [0, 0, 1, 0], [], []>} : vector<256x128xf32>, vector<256x128xf32>, vector<256x256xf32> -> vector<256x256xf32>
    %c0_i32 = arith.constant 0 : i32
    %3 = arith.cmpi eq, %arg2, %c0_i32 : i32
    %4 = arith.extui %3 : i1 to i32
    %c0_i32_3 = arith.constant 0 : i32
    %5 = arith.cmpi ne, %4, %c0_i32_3 : i32
    scf.if %5 {
      %c0_8 = arith.constant 0 : index
      %c0_9 = arith.constant 0 : index
      %12 = vector.load %arg7[%c0_8, %c0_9] : memref<256x256xf32, #tpu.memory_space<vmem>>, vector<256x256xf32>
      tpu.vector_store %arg7[%c0_8, %c0_9], %2 {strides = array<i32>} : memref<256x256xf32, #tpu.memory_space<vmem>>, vector<256x256xf32>,
    } else {
    }
    %c0_i32_4 = arith.constant 0 : i32
    %6 = arith.cmpi ne, %arg2, %c0_i32_4 : i32
    %7 = arith.extui %6 : i1 to i32
    %c0_i32_5 = arith.constant 0 : i32
    %8 = arith.cmpi ne, %7, %c0_i32_5 : i32
    scf.if %8 {
      %c0_8 = arith.constant 0 : index
      %c0_9 = arith.constant 0 : index
      %12 = vector.load %arg7[%c0_8, %c0_9] : memref<256x256xf32, #tpu.memory_space<vmem>>, vector<256x256xf32>
      %13 = arith.addf %12, %2 : vector<256x256xf32>
      %c0_10 = arith.constant 0 : index
      %c0_11 = arith.constant 0 : index
      %14 = vector.load %arg7[%c0_10, %c0_11] : memref<256x256xf32, #tpu.memory_space<vmem>>, vector<256x256xf32>
      tpu.vector_store %arg7[%c0_10, %c0_11], %13 {strides = array<i32>} : memref<256x256xf32, #tpu.memory_space<vmem>>, vector<256x256xf32>,
    } else {
    }
    %c0_i32_6 = arith.constant 0 : i32
    %9 = arith.cmpi eq, %arg2, %c0_i32_6 : i32
    %10 = arith.extui %9 : i1 to i32
    %c0_i32_7 = arith.constant 0 : i32
    %11 = arith.cmpi ne, %10, %c0_i32_7 : i32
    scf.if %11 {
      %c0_8 = arith.constant 0 : index
      %c0_9 = arith.constant 0 : index
      %12 = vector.load %arg5[%c0_8, %c0_9] : memref<256x1xf32, #tpu.memory_space<vmem>>, vector<256x1xf32>
      %c0_10 = arith.constant 0 : index
      %c0_11 = arith.constant 0 : index
      %13 = vector.load %arg6[%c0_10, %c0_11] : memref<1x256xf32, #tpu.memory_space<vmem>>, vector<1x256xf32>
      %14 = vector.broadcast %12 : vector<256x1xf32> to vector<256x256xf32>
      %15 = vector.broadcast %13 : vector<1x256xf32> to vector<256x256xf32>
      %16 = arith.addf %14, %15 : vector<256x256xf32>
      %c0_12 = arith.constant 0 : index
      %c0_13 = arith.constant 0 : index
      %17 = vector.load %arg7[%c0_12, %c0_13] : memref<256x256xf32, #tpu.memory_space<vmem>>, vector<256x256xf32>
      %cst_14 = arith.constant 2.000000e+00 : f32
      %18 = vector.broadcast %cst_14 : f32 to vector<256x256xf32>
      %19 = arith.mulf %18, %17 : vector<256x256xf32>
      %20 = arith.subf %16, %19 : vector<256x256xf32>
      %cst_15 = arith.constant 0.000000e+00 : f32
      %21 = vector.broadcast %cst_15 : f32 to vector<256x256xf32>
      %22 = arith.maximumf %20, %21 : vector<256x256xf32>
      %c0_16 = arith.constant 0 : index
      %c0_17 = arith.constant 0 : index
      %23 = vector.load %arg7[%c0_16, %c0_17] : memref<256x256xf32, #tpu.memory_space<vmem>>, vector<256x256xf32>
      tpu.vector_store %arg7[%c0_16, %c0_17], %22 {strides = array<i32>} : memref<256x256xf32, #tpu.memory_space<vmem>>, vector<256x256xf32>,
    } else {
    }
    return
  }
  func.func @transform_0(%arg0: i32, %arg1: i32, %arg2: i32) -> (i32, i32) {
    %c0_i32 = arith.constant 0 : i32
    return %arg0, %arg2 : i32, i32
  }
  func.func @transform_1(%arg0: i32, %arg1: i32, %arg2: i32) -> (i32, i32) {
    %c0_i32 = arith.constant 0 : i32
    return %arg1, %arg2 : i32, i32
  }
  func.func @transform_2(%arg0: i32, %arg1: i32, %arg2: i32) -> (i32, i32) {
    %c0_i32 = arith.constant 0 : i32
    %c0_i32_0 = arith.constant 0 : i32
    return %arg0, %c0_i32 : i32, i32
  }
  func.func @transform_3(%arg0: i32, %arg1: i32, %arg2: i32) -> (i32, i32) {
    %c0_i32 = arith.constant 0 : i32
    %c0_i32_0 = arith.constant 0 : i32
    return %c0_i32, %arg1 : i32, i32
  }
  func.func @transform_4(%arg0: i32, %arg1: i32, %arg2: i32) -> (i32, i32) {
    %c0_i32 = arith.constant 0 : i32
    return %arg0, %arg1 : i32, i32
  }
}

</mosaic_0001>

<bundles_post_ra>
// kernel: tpu_custom_call.1
= control target key start
LH: loop header
LB: loop body
LE: loop exit
PB: predicated region body
PF: predicated region fallthrough
CT: control target
= control target key end

     0   :  { %9 = vsyncpa [#allocation3], 0  ;;  %s1643_s0 = inlined_call_operand.vmem [shape: f32[256,128], index: 0, kind: input, shape index: {}]   ;;  %s1644_s1 = inlined_call_operand.hbm [shape: f32[256,128], index: 1, kind: input, shape index: {}]   ;;  %s1645_s2 = inlined_call_operand.vmem [shape: f32[256,1], index: 2, kind: input, shape index: {}]   ;;  %s1646_s3 = inlined_call_operand.vmem [shape: f32[1,256], index: 3, kind: input, shape index: {}]   ;;  %s1647_s4 = inlined_call_operand.hbm [shape: f32[256,256], index: 4, kind: output, shape index: {}]  }
   0x1   :  { %10 = vsyncpa [#allocation4], 0  ;;  %s17_s17 = sshll.u32 %s1644_s1, 4  ;;  %s1286_s18 = smov [#allocation2]   ;;  %s18_s17 = int_to_ptr.hbm [resolvable:$true] %s17_s17 }
   0x2   :  { %s19_s19 = sshll.u32 %s1286_s18, 4  ;;  %s1287_s20 = smov 128   ;;  %s20_s19 = int_to_ptr.vmem [resolvable:$true] %s19_s19 }
   0x3   :  { %s1288_s21 = smov 8  }
   0x4   :  { %25 = dma.hbm_to_vmem [thread:$0]  %s18_s17, 4096, %s20_s19, [#allocation3], %s1287_s20, %s1287_s20, %s1288_s21  }
   0x5   :  { %1282 = dma.done.wait [#allocation3], 4096  }
   0x6   :  { %1283 = vsyncadd [#allocation3], 4294963200  ;;  %v81_v0 = vld [vmem:[#allocation2 + $0x78] sm:$0xff]  ;;  %v80_v2 = vld [vmem:[#allocation2 + $0x70] sm:$0xff]  ;;  %v1289_v10 = vmov 0   ;;  %s1291_s18 = smov 256  }
   0x7   :  { %v97_v1 = vld [vmem:[#allocation2 + $0xf8] sm:$0xff]  ;;  %98 = vmatpush.xpose.msra.mxu0 %v81_v0  ;;  %1192 = vmatpush.xpose.msra.mxu2 %v81_v0  ;;  %v96_v3 = vld [vmem:[#allocation2 + $0xf0] sm:$0xff]  ;;  %v79_v4 = vld [vmem:[#allocation2 + $0x68] sm:$0xff]  ;;  %s1292_s19 = smov 16  }
   0x8   :  { %211 = vmatpush.xpose.msra.mxu1 %v97_v1  ;;  %1208 = vmatpush.xpose.msra.mxu3 %v97_v1  ;;  %v95_v5 = vld [vmem:[#allocation2 + $0xe8] sm:$0xff]  ;;  %v593_v6 = vld [vmem:[%s1645_s2 + $0x10] sm:$0xff]  ;;  %v591_v7 = vld [vmem:[%s1645_s2] sm:$0xff] }
   0x9   :  { %v78_v8 = vld [vmem:[#allocation2 + $0x60] sm:$0xff]  ;;  %1232 = vset.pattern.permute.xlu1 %v1289_v10  ;;  %1231 = vset.pattern.permute.xlu0 %v1289_v10  ;;  %v77_v11 = vld [vmem:[#allocation2 + $0x58] sm:$0xff]  ;;  %v592_v14 = vld [vmem:[%s1645_s2 + $0x8] sm:$0xff] }
   0xa   :  { %v94_v9 = vld [vmem:[#allocation2 + $0xe0] sm:$0xff]  ;;  %636 = vperm.xlu1 %1232, %v593_v6   ;;  %626 = vperm.xlu0 %1231, %v591_v7   ;;  %v93_v12 = vld [vmem:[#allocation2 + $0xd8] sm:$0xff]  ;;  %v76_v15 = vld [vmem:[#allocation2 + $0x50] sm:$0xff] }
   0xb   :  { %99 = vmatpush.xpose.msra.mxu0 %v80_v2  ;;  %1193 = vmatpush.xpose.msra.mxu2 %v80_v2  ;;  %v594_v13 = vld [vmem:[%s1645_s2 + $0x18] sm:$0xff]  ;;  %v92_v16 = vld [vmem:[#allocation2 + $0xd0] sm:$0xff]  ;;  %v75_v17 = vld [vmem:[#allocation2 + $0x48] sm:$0xff] }
   0xc   :  { %212 = vmatpush.xpose.msra.mxu1 %v96_v3  ;;  %1209 = vmatpush.xpose.msra.mxu3 %v96_v3  ;;  %v91_v18 = vld [vmem:[#allocation2 + $0xc8] sm:$0xff]  ;;  %v598_v19 = vld [vmem:[%s1645_s2 + $0x38] sm:$0xff]  ;;  %v597_v20 = vld [vmem:[%s1645_s2 + $0x30] sm:$0xff] }
   0xd   :  { %1233 = vset.pattern.permute.xlu2 %v1289_v10  ;;  %v74_v21 = vld [vmem:[#allocation2 + $0x40] sm:$0xff]  ;;  %v73_v23 = vld [vmem:[#allocation2 + $0x38] sm:$0xff]  ;;  %v601_v25 = vld [vmem:[%s1645_s2 + $0x50] sm:$0xff] }
   0xe   :  { %v90_v22 = vld [vmem:[#allocation2 + $0xc0] sm:$0xff]  ;;  %v89_v24 = vld [vmem:[#allocation2 + $0xb8] sm:$0xff]  ;;  %v600_v26 = vld [vmem:[%s1645_s2 + $0x48] sm:$0xff] }
   0xf   :  { %100 = vmatpush.xpose.msra.mxu0 %v79_v4  ;;  %1194 = vmatpush.xpose.msra.mxu2 %v79_v4  ;;  %v72_v27 = vld [vmem:[#allocation2 + $0x30] sm:$0xff]  ;;  %v71_v29 = vld [vmem:[#allocation2 + $0x28] sm:$0xff]  ;;  %v595_v31 = vld [vmem:[%s1645_s2 + $0x20] sm:$0xff] }
  0x10   :  { %213 = vmatpush.xpose.msra.mxu1 %v95_v5  ;;  %1210 = vmatpush.xpose.msra.mxu3 %v95_v5  ;;  %v88_v28 = vld [vmem:[#allocation2 + $0xb0] sm:$0xff]  ;;  %v87_v30 = vld [vmem:[#allocation2 + $0xa8] sm:$0xff]  ;;  %v70_v33 = vld [vmem:[#allocation2 + $0x20] sm:$0xff] }
  0x11   :  { %v604_v32 = vld [vmem:[%s1645_s2 + $0x68] sm:$0xff]  ;;  %v603_v34 = vld [vmem:[%s1645_s2 + $0x60] sm:$0xff]  ;;  %646 = vperm.xlu2 %1233, %v595_v31   ;;  %v69_v36 = vld [vmem:[#allocation2 + $0x18] sm:$0xff] }
  0x12   :  { %641 = vperm.xlu1 %1232, %v594_v13   ;;  %631 = vperm.xlu0 %1231, %v592_v14   ;;  %v86_v35 = vld [vmem:[#allocation2 + $0xa0] sm:$0xff]  ;;  %v85_v37 = vld [vmem:[#allocation2 + $0x98] sm:$0xff]  ;;  %v596_v38 = vld [vmem:[%s1645_s2 + $0x28] sm:$0xff] }
  0x13   :  { %101 = vmatpush.xpose.msra.mxu0 %v78_v8  ;;  %1195 = vmatpush.xpose.msra.mxu2 %v78_v8  ;;  %v607_v39 = vld [vmem:[%s1645_s2 + $0x80] sm:$0xff]  ;;  %v68_v40 = vld [vmem:[#allocation2 + $0x10] sm:$0xff]  ;;  %v606_v41 = vld [vmem:[%s1645_s2 + $0x78] sm:$0xff] }
  0x14   :  { %214 = vmatpush.xpose.msra.mxu1 %v94_v9  ;;  %1211 = vmatpush.xpose.msra.mxu3 %v94_v9  ;;  %v84_v42 = vld [vmem:[#allocation2 + $0x90] sm:$0xff]  ;;  %v67_v43 = vld [vmem:[#allocation2 + $0x8] sm:$0xff]  ;;  %v599_v45 = vld [vmem:[%s1645_s2 + $0x40] sm:$0xff] }
  0x15   :  { %v83_v44 = vld [vmem:[#allocation2 + $0x88] sm:$0xff]  ;;  %v610_v46 = vld [vmem:[%s1645_s2 + $0x98] sm:$0xff]  ;;  %v66_v47 = vld [vmem:[#allocation2] sm:$0xff] }
  0x16   :  { %v609_v48 = vld [vmem:[%s1645_s2 + $0x90] sm:$0xff]  ;;  %v82_v49 = vld [vmem:[#allocation2 + $0x80] sm:$0xff]  ;;  %v602_v52 = vld [vmem:[%s1645_s2 + $0x58] sm:$0xff] }
  0x17   :  { %102 = vmatpush.xpose.msra.mxu0 %v77_v11  ;;  %1196 = vmatpush.xpose.msra.mxu2 %v77_v11  ;;  %v34_v50 = vld [vmem:[%s1643_s0] sm:$0xff]  ;;  %v613_v53 = vld [vmem:[%s1645_s2 + $0xb0] sm:$0xff]  ;;  %v612_v54 = vld [vmem:[%s1645_s2 + $0xa8] sm:$0xff] }
  0x18   :  { %215 = vmatpush.xpose.msra.mxu1 %v93_v12  ;;  %1212 = vmatpush.xpose.msra.mxu3 %v93_v12  ;;  %v50_v51 = vld [vmem:[%s1643_s0 + $0x80] sm:$0xff]  ;;  %v35_v55 = vld [vmem:[%s1643_s0 + $0x8] sm:$0xff]  ;;  %v605_v57 = vld [vmem:[%s1645_s2 + $0x70] sm:$0xff] }
  0x19   :  { %651 = vperm.xlu2 %1233, %v596_v38   ;;  %v51_v56 = vld [vmem:[%s1643_s0 + $0x88] sm:$0xff]  ;;  %v615_v59 = vld [vmem:[%s1645_s2 + $0xc0] sm:$0xff]  ;;  %v36_v60 = vld [vmem:[%s1643_s0 + $0x10] sm:$0xff] }
  0x1a   :  { %661 = vperm.xlu1 %1232, %v598_v19   ;;  %656 = vperm.xlu0 %1231, %v597_v20   ;;  %v616_v58 = vld [vmem:[%s1645_s2 + $0xc8] sm:$0xff]  ;;  %v52_v61 = vld [vmem:[%s1643_s0 + $0x90] sm:$0xff]  ;;  %v619_v63 = vld [vmem:[%s1645_s2 + $0xe0] sm:$0xff] }
  0x1b   :  { %103 = vmatpush.xpose.msra.mxu0 %v76_v15  ;;  %1197 = vmatpush.xpose.msra.mxu2 %v76_v15  ;;  %v608_v62 = vld [vmem:[%s1645_s2 + $0x88] sm:$0xff]  ;;  %v618_v0 = vld [vmem:[%s1645_s2 + $0xd8] sm:$0xff]  ;;  %v621_v4 = vld [vmem:[%s1645_s2 + $0xf0] sm:$0xff] }
  0x1c   :  { %216 = vmatpush.xpose.msra.mxu1 %v92_v16  ;;  %1213 = vmatpush.xpose.msra.mxu3 %v92_v16  ;;  %v37_v1 = vld [vmem:[%s1643_s0 + $0x18] sm:$0xff]  ;;  %v38_v5 = vld [vmem:[%s1643_s0 + $0x20] sm:$0xff]  ;;  %v39_v8 = vld [vmem:[%s1643_s0 + $0x28] sm:$0xff] }
  0x1d   :  { %v53_v2 = vld [vmem:[%s1643_s0 + $0x98] sm:$0xff]  ;;  %v54_v6 = vld [vmem:[%s1643_s0 + $0xa0] sm:$0xff]  ;;  %v55_v9 = vld [vmem:[%s1643_s0 + $0xa8] sm:$0xff] }
  0x1e   :  { %v622_v3 = vld [vmem:[%s1645_s2 + $0xf8] sm:$0xff]  ;;  %v611_v7 = vld [vmem:[%s1645_s2 + $0xa0] sm:$0xff]  ;;  %v40_v11 = vld [vmem:[%s1643_s0 + $0x30] sm:$0xff] }
  0x1f   :  { %104 = vmatpush.xpose.msra.mxu0 %v75_v17  ;;  %1198 = vmatpush.xpose.msra.mxu2 %v75_v17  ;;  %v614_v10 = vld [vmem:[%s1645_s2 + $0xb8] sm:$0xff]  ;;  %v56_v12 = vld [vmem:[%s1643_s0 + $0xb0] sm:$0xff]  ;;  %v620_v16 = vld [vmem:[%s1645_s2 + $0xe8] sm:$0xff] }
  0x20   :  { %217 = vmatpush.xpose.msra.mxu1 %v91_v18  ;;  %1214 = vmatpush.xpose.msra.mxu3 %v91_v18  ;;  %v617_v13 = vld [vmem:[%s1645_s2 + $0xd0] sm:$0xff]  ;;  %v41_v14 = vld [vmem:[%s1643_s0 + $0x38] sm:$0xff]  ;;  %v42_v17 = vld [vmem:[%s1643_s0 + $0x40] sm:$0xff]  ;;  %s1179_s2 = sshll.u32 %s1647_s4, 4  ;;  %s1180_s2 = int_to_ptr.hbm [resolvable:$true] %s1179_s2 }
  0x21   :  { %666 = vperm.xlu2 %1233, %v599_v45   ;;  %v57_v15 = vld [vmem:[%s1643_s0 + $0xb8] sm:$0xff]  ;;  %v58_v18 = vld [vmem:[%s1643_s0 + $0xc0] sm:$0xff]  ;;  %v43_v19 = vld [vmem:[%s1643_s0 + $0x48] sm:$0xff] }
  0x22   :  { %676 = vperm.xlu1 %1232, %v601_v25   ;;  %671 = vperm.xlu0 %1231, %v600_v26   ;;  %v59_v20 = vld [vmem:[%s1643_s0 + $0xc8] sm:$0xff]  ;;  %v45_v25 = vld [vmem:[%s1643_s0 + $0x58] sm:$0xff] }
  0x23   :  { %105 = vmatpush.xpose.msra.mxu0 %v74_v21  ;;  %1199 = vmatpush.xpose.msra.mxu2 %v74_v21  ;;  %v44_v21 = vld [vmem:[%s1643_s0 + $0x50] sm:$0xff]  ;;  %v61_v26 = vld [vmem:[%s1643_s0 + $0xd8] sm:$0xff] }
  0x24   :  { %218 = vmatpush.xpose.msra.mxu1 %v90_v22  ;;  %1215 = vmatpush.xpose.msra.mxu3 %v90_v22  ;;  %v60_v22 = vld [vmem:[%s1643_s0 + $0xd0] sm:$0xff]  ;;  %v65_v45 = vld [vmem:[%s1643_s0 + $0xf8] sm:$0xff] }
  0x27   :  { %106 = vmatpush.xpose.msra.mxu0 %v73_v23  ;;  %1200 = vmatpush.xpose.msra.mxu2 %v73_v23 }
  0x28   :  { %219 = vmatpush.xpose.msra.mxu1 %v89_v24  ;;  %1216 = vmatpush.xpose.msra.mxu3 %v89_v24 }
  0x29   :  { %681 = vperm.xlu2 %1233, %v602_v52  }
  0x2a   :  { %691 = vperm.xlu1 %1232, %v604_v32   ;;  %686 = vperm.xlu0 %1231, %v603_v34   ;;  %v47_v34 = vld [vmem:[%s1643_s0 + $0x68] sm:$0xff] }
  0x2b   :  { %107 = vmatpush.xpose.msra.mxu0 %v72_v27  ;;  %1201 = vmatpush.xpose.msra.mxu2 %v72_v27 }
  0x2c   :  { %220 = vmatpush.xpose.msra.mxu1 %v88_v28  ;;  %1217 = vmatpush.xpose.msra.mxu3 %v88_v28 }
  0x2f   :  { %108 = vmatpush.xpose.msra.mxu0 %v71_v29  ;;  %1202 = vmatpush.xpose.msra.mxu2 %v71_v29  ;;  %v46_v29 = vld [vmem:[%s1643_s0 + $0x60] sm:$0xff] }
  0x30   :  { %221 = vmatpush.xpose.msra.mxu1 %v87_v30  ;;  %1218 = vmatpush.xpose.msra.mxu3 %v87_v30  ;;  %v62_v30 = vld [vmem:[%s1643_s0 + $0xe0] sm:$0xff] }
  0x31   :  { %696 = vperm.xlu2 %1233, %v605_v57  }
  0x32   :  { %706 = vperm.xlu1 %1232, %v607_v39   ;;  %701 = vperm.xlu0 %1231, %v606_v41   ;;  %v48_v39 = vld [vmem:[%s1643_s0 + $0x70] sm:$0xff] }
  0x33   :  { %109 = vmatpush.xpose.msra.mxu0 %v70_v33  ;;  %1203 = vmatpush.xpose.msra.mxu2 %v70_v33 }
  0x34   :  { %222 = vmatpush.xpose.msra.mxu1 %v86_v35  ;;  %1219 = vmatpush.xpose.msra.mxu3 %v86_v35  ;;  %v63_v35 = vld [vmem:[%s1643_s0 + $0xe8] sm:$0xff] }
  0x37   :  { %110 = vmatpush.xpose.msra.mxu0 %v69_v36  ;;  %1204 = vmatpush.xpose.msra.mxu2 %v69_v36 }
  0x38   :  { %223 = vmatpush.xpose.msra.mxu1 %v85_v37  ;;  %1220 = vmatpush.xpose.msra.mxu3 %v85_v37 }
  0x39   :  { %711 = vperm.xlu2 %1233, %v608_v62  }
  0x3a   :  { %721 = vperm.xlu1 %1232, %v610_v46   ;;  %716 = vperm.xlu0 %1231, %v609_v48  }
  0x3b   :  { %111 = vmatpush.xpose.msra.mxu0 %v68_v40  ;;  %1205 = vmatpush.xpose.msra.mxu2 %v68_v40  ;;  %v64_v40 = vld [vmem:[%s1643_s0 + $0xf0] sm:$0xff] }
  0x3c   :  { %224 = vmatpush.xpose.msra.mxu1 %v84_v42  ;;  %1221 = vmatpush.xpose.msra.mxu3 %v84_v42 }
  0x3f   :  { %112 = vmatpush.xpose.msra.mxu0 %v67_v43  ;;  %1206 = vmatpush.xpose.msra.mxu2 %v67_v43  ;;  %v623_v43 = vld [vmem:[%s1646_s3] sm:$0x3] }
  0x40   :  { %225 = vmatpush.xpose.msra.mxu1 %v83_v44  ;;  %1222 = vmatpush.xpose.msra.mxu3 %v83_v44  ;;  %v49_v44 = vld [vmem:[%s1643_s0 + $0x78] sm:$0xff]  ;;  %v1540_v48 = vperm.slane %v623_v43, 1  ;;  %s1290_s0 = smov [#allocation5]  }
  0x41   :  { %726 = vperm.xlu2 %1233, %v611_v7   ;;  %s1177_s3 = sshll.u32 %s1290_s0, 4  ;;  %s1178_s3 = int_to_ptr.vmem [resolvable:$true] %s1177_s3 }
  0x42   :  { %736 = vperm.xlu1 %1232, %v613_v53   ;;  %731 = vperm.xlu0 %1231, %v612_v54  }
  0x43   :  { %113 = vmatpush.xpose.msra.mxu0 %v66_v47  ;;  %1207 = vmatpush.xpose.msra.mxu2 %v66_v47  ;;  %v1538_v47 = vperm.slane %v623_v43, 0 }
  0x44   :  { %226 = vmatpush.xpose.msra.mxu1 %v82_v49  ;;  %1223 = vmatpush.xpose.msra.mxu3 %v82_v49 }
  0x46   :  { %114 = vmatmul.f32.vlgmr.msra.gmra.mxu0 %v34_v50  ;;  %162 = vmatmul.f32.vlgmr.msra.gmra.mxu2 %v50_v51 }
  0x47   :  { %227 = vmatmul.f32.vlgmr.msra.gmra.mxu1 %v34_v50  ;;  %275 = vmatmul.f32.vlgmr.msra.gmra.mxu3 %v50_v51 }
  0x49   :  { %741 = vperm.xlu2 %1233, %v614_v10  }
  0x4a   :  { %751 = vperm.xlu1 %1232, %v616_v58   ;;  %746 = vperm.xlu0 %1231, %v615_v59  }
  0x4e   :  { %117 = vmatmul.f32.gmra.mxu0 %v35_v55  ;;  %165 = vmatmul.f32.gmra.mxu2 %v51_v56 }
  0x4f   :  { %230 = vmatmul.f32.gmra.mxu1 %v35_v55  ;;  %278 = vmatmul.f32.gmra.mxu3 %v51_v56 }
  0x51   :  { %756 = vperm.xlu2 %1233, %v617_v13  }
  0x52   :  { %766 = vperm.xlu1 %1232, %v619_v63   ;;  %761 = vperm.xlu0 %1231, %v618_v0  }
  0x56   :  { %120 = vmatmul.f32.gmra.mxu0 %v36_v60  ;;  %168 = vmatmul.f32.gmra.mxu2 %v52_v61 }
  0x57   :  { %233 = vmatmul.f32.gmra.mxu1 %v36_v60  ;;  %281 = vmatmul.f32.gmra.mxu3 %v52_v61 }
  0x59   :  { %771 = vperm.xlu2 %1233, %v620_v16  }
  0x5a   :  { %781 = vperm.xlu1 %1232, %v622_v3   ;;  %776 = vperm.xlu0 %1231, %v621_v4  }
  0x5e   :  { %123 = vmatmul.f32.gmra.mxu0 %v37_v1  ;;  %171 = vmatmul.f32.gmra.mxu2 %v53_v2 }
  0x5f   :  { %236 = vmatmul.f32.gmra.mxu1 %v37_v1  ;;  %284 = vmatmul.f32.gmra.mxu3 %v53_v2 }
  0x66   :  { %126 = vmatmul.f32.gmra.mxu0 %v38_v5  ;;  %174 = vmatmul.f32.gmra.mxu2 %v54_v6 }
  0x67   :  { %239 = vmatmul.f32.gmra.mxu1 %v38_v5  ;;  %287 = vmatmul.f32.gmra.mxu3 %v54_v6 }
  0x6b   :  { %v1491_v27 = vpop.permute.xlu2 %646 }
  0x6e   :  { %129 = vmatmul.f32.gmra.mxu0 %v39_v8  ;;  %177 = vmatmul.f32.gmra.mxu2 %v55_v9 }
  0x6f   :  { %242 = vmatmul.f32.gmra.mxu1 %v39_v8  ;;  %290 = vmatmul.f32.gmra.mxu3 %v55_v9 }
  0x73   :  { %v1501_v32 = vpop.permute.xlu2 %651 }
  0x76   :  { %132 = vmatmul.f32.gmra.mxu0 %v40_v11  ;;  %180 = vmatmul.f32.gmra.mxu2 %v56_v12 }
  0x77   :  { %245 = vmatmul.f32.gmra.mxu1 %v40_v11  ;;  %293 = vmatmul.f32.gmra.mxu3 %v56_v12 }
  0x7b   :  { %v1513_v37 = vpop.permute.xlu2 %666 }
  0x7c   :  { %v1483_v23 = vpop.permute.xlu1 %636  ;;  %v627_v24 = vpop.permute.xlu0 %626 }
  0x7d   :  { %v789_v49 = vadd.f32 %v1538_v47, %v627_v24  ;;  %v790_v51 = vadd.f32 %v1540_v48, %v627_v24  ;;  %v793_v24 = vadd.f32 %v1538_v47, %v1483_v23 }
  0x7e   :  { %135 = vmatmul.f32.gmra.mxu0 %v41_v14  ;;  %183 = vmatmul.f32.gmra.mxu2 %v57_v15 }
  0x7f   :  { %248 = vmatmul.f32.gmra.mxu1 %v41_v14  ;;  %296 = vmatmul.f32.gmra.mxu3 %v57_v15 }
  0x83   :  { %v1525_v42 = vpop.permute.xlu2 %681 }
  0x84   :  { %v1493_v28 = vpop.permute.xlu1 %641  ;;  %v632_v31 = vpop.permute.xlu0 %631 }
  0x85   :  { %v791_v1 = vadd.f32 %v1538_v47, %v632_v31  ;;  %v792_v4 = vadd.f32 %v1540_v48, %v632_v31 }
  0x86   :  { %138 = vmatmul.f32.gmra.mxu0 %v42_v17  ;;  %186 = vmatmul.f32.gmra.mxu2 %v58_v18 }
  0x87   :  { %251 = vmatmul.f32.gmra.mxu1 %v42_v17  ;;  %299 = vmatmul.f32.gmra.mxu3 %v58_v18 }
  0x8b   :  { %v1546_v53 = vpop.permute.xlu2 %696 }
  0x8c   :  { %v1503_v33 = vpop.permute.xlu1 %661  ;;  %v1511_v36 = vpop.permute.xlu0 %656 }
  0x8e   :  { %141 = vmatmul.f32.gmra.mxu0 %v43_v19  ;;  %189 = vmatmul.f32.gmra.mxu2 %v59_v20 }
  0x8f   :  { %254 = vmatmul.f32.gmra.mxu1 %v43_v19  ;;  %302 = vmatmul.f32.gmra.mxu3 %v59_v20 }
  0x93   :  { %v712_v13 = vpop.permute.xlu2 %711 }
  0x94   :  { %v1515_v38 = vpop.permute.xlu1 %676  ;;  %v1523_v41 = vpop.permute.xlu0 %671  ;;  %v823_v19 = vadd.f32 %v1538_v47, %v712_v13 }
  0x96   :  { %144 = vmatmul.f32.gmra.mxu0 %v44_v21  ;;  %192 = vmatmul.f32.gmra.mxu2 %v60_v22 }
  0x97   :  { %257 = vmatmul.f32.gmra.mxu1 %v44_v21  ;;  %305 = vmatmul.f32.gmra.mxu3 %v60_v22  ;;  %v824_v22 = vadd.f32 %v1540_v48, %v712_v13 }
  0x9c   :  { %v1536_v46 = vpop.permute.xlu1 %691  ;;  %v1543_v50 = vpop.permute.xlu0 %686 }
  0x9e   :  { %147 = vmatmul.f32.gmra.mxu0 %v45_v25  ;;  %195 = vmatmul.f32.gmra.mxu2 %v61_v26 }
  0x9f   :  { %260 = vmatmul.f32.gmra.mxu1 %v45_v25  ;;  %308 = vmatmul.f32.gmra.mxu3 %v61_v26 }
  0xa4   :  { %v707_v57 = vpop.permute.xlu1 %706  ;;  %v1552_v12 = vpop.permute.xlu0 %701 }
  0xa5   :  { %v821_v61 = vadd.f32 %v1538_v47, %v707_v57  ;;  %v822_v0 = vadd.f32 %v1540_v48, %v707_v57 }
  0xa6   :  { %150 = vmatmul.f32.gmra.mxu0 %v46_v29  ;;  %198 = vmatmul.f32.gmra.mxu2 %v62_v30 }
  0xa7   :  { %263 = vmatmul.f32.gmra.mxu1 %v46_v29  ;;  %311 = vmatmul.f32.gmra.mxu3 %v62_v30  ;;  %v794_v29 = vadd.f32 %v1540_v48, %v1483_v23 }
  0xae   :  { %153 = vmatmul.f32.gmra.mxu0 %v47_v34  ;;  %201 = vmatmul.f32.gmra.mxu2 %v63_v35 }
  0xaf   :  { %266 = vmatmul.f32.gmra.mxu1 %v47_v34  ;;  %314 = vmatmul.f32.gmra.mxu3 %v63_v35 }
  0xb6   :  { %156 = vmatmul.f32.gmra.mxu0 %v48_v39  ;;  %204 = vmatmul.f32.gmra.mxu2 %v64_v40 }
  0xb7   :  { %269 = vmatmul.f32.gmra.mxu1 %v48_v39  ;;  %317 = vmatmul.f32.gmra.mxu3 %v64_v40 }
  0xbe   :  { %159 = vmatmul.f32.gmra.mxu0 %v49_v44  ;;  %207 = vmatmul.f32.gmra.mxu2 %v65_v45 }
  0xbf   :  { %272 = vmatmul.f32.gmra.mxu1 %v49_v44  ;;  %320 = vmatmul.f32.gmra.mxu3 %v65_v45 }
  0xc3   :  { %v115_v52 = vpop.f32.mrf.mxu0 }
  0xc4   :  { %v917_v54 = vmul.f32 2.0, %v115_v52  ;;  %v228_v55 = vpop.f32.mrf.mxu1  ;;  %v717_v52 = vpop.permute.xlu0 %716 }
  0xc5   :  { %v918_v56 = vmul.f32 2.0, %v228_v55  ;;  %v825_v55 = vadd.f32 %v1538_v47, %v717_v52  ;;  %v826_v23 = vadd.f32 %v1540_v48, %v717_v52  ;;  %v800_v52 = vadd.f32 %v1540_v48, %v1501_v32 }
  0xc6   :  { %v981_v58 = vsub.f32 %v789_v49, %v917_v54 }
  0xc7   :  { %v982_v59 = vsub.f32 %v790_v51, %v918_v56 }
  0xc8   :  { %v1045_v60 = vmax.f32 %v981_v58, 0.0  ;;  %v795_v58 = vadd.f32 %v1538_v47, %v1493_v28 }
  0xc9   :  { %v1046_v62 = vmax.f32 %v982_v59, 0.0  ;;  %v163_v63 = vpop.f32.mrf.mxu2 }
  0xca   :  { %1109 = vst [vmem:[#allocation5] sm:$0xff] %v1045_v60  ;;  %v276_v2 = vpop.f32.mrf.mxu3  ;;  %v949_v3 = vmul.f32 2.0, %v163_v63 }
  0xcb   :  { %1110 = vst [vmem:[#allocation5 + $0x8] sm:$0xff] %v1046_v62  ;;  %v118_v5 = vpop.f32.mrf.mxu0  ;;  %v950_v6 = vmul.f32 2.0, %v276_v2 }
  0xcc   :  { %v919_v7 = vmul.f32 2.0, %v118_v5  ;;  %v231_v8 = vpop.f32.mrf.mxu1  ;;  %v1013_v9 = vsub.f32 %v821_v61, %v949_v3  ;;  %v796_v61 = vadd.f32 %v1540_v48, %v1493_v28 }
  0xcd   :  { %v920_v10 = vmul.f32 2.0, %v231_v8  ;;  %v1014_v11 = vsub.f32 %v822_v0, %v950_v6 }
  0xce   :  { %v983_v14 = vsub.f32 %v791_v1, %v919_v7  ;;  %v1077_v15 = vmax.f32 %v1013_v9, 0.0  ;;  %v722_v7 = vpop.permute.xlu1 %721 }
  0xcf   :  { %v984_v16 = vsub.f32 %v792_v4, %v920_v10  ;;  %v1078_v17 = vmax.f32 %v1014_v11, 0.0  ;;  %v827_v10 = vadd.f32 %v1538_v47, %v722_v7  ;;  %v828_v13 = vadd.f32 %v1540_v48, %v722_v7 }
  0xd0   :  { %v1047_v18 = vmax.f32 %v983_v14, 0.0  ;;  %1141 = vst [vmem:[#allocation5 + $0x100] sm:$0xff] %v1077_v15  ;;  %v797_v15 = vadd.f32 %v1538_v47, %v1491_v27 }
  0xd1   :  { %v1048_v20 = vmax.f32 %v984_v16, 0.0  ;;  %1142 = vst [vmem:[#allocation5 + $0x108] sm:$0xff] %v1078_v17  ;;  %v166_v21 = vpop.f32.mrf.mxu2 }
  0xd2   :  { %1111 = vst [vmem:[#allocation5 + $0x10] sm:$0xff] %v1047_v18  ;;  %v279_v25 = vpop.f32.mrf.mxu3  ;;  %v951_v26 = vmul.f32 2.0, %v166_v21  ;;  %v798_v18 = vadd.f32 %v1540_v48, %v1491_v27 }
  0xd3   :  { %1112 = vst [vmem:[#allocation5 + $0x18] sm:$0xff] %v1048_v20  ;;  %v121_v30 = vpop.f32.mrf.mxu0  ;;  %v952_v31 = vmul.f32 2.0, %v279_v25 }
  0xd4   :  { %v921_v34 = vmul.f32 2.0, %v121_v30  ;;  %v234_v35 = vpop.f32.mrf.mxu1  ;;  %v1015_v39 = vsub.f32 %v823_v19, %v951_v26 }
  0xd5   :  { %v922_v40 = vmul.f32 2.0, %v234_v35  ;;  %v1016_v43 = vsub.f32 %v824_v22, %v952_v31  ;;  %v727_v35 = vpop.permute.xlu2 %726 }
  0xd6   :  { %v985_v44 = vsub.f32 %v793_v24, %v921_v34  ;;  %v1079_v45 = vmax.f32 %v1015_v39, 0.0  ;;  %v830_v27 = vadd.f32 %v1540_v48, %v727_v35 }
  0xd7   :  { %v986_v49 = vsub.f32 %v794_v29, %v922_v40  ;;  %v1080_v51 = vmax.f32 %v1016_v43, 0.0  ;;  %v829_v40 = vadd.f32 %v1538_v47, %v727_v35 }
  0xd8   :  { %v1049_v54 = vmax.f32 %v985_v44, 0.0  ;;  %1143 = vst [vmem:[#allocation5 + $0x110] sm:$0xff] %v1079_v45  ;;  %v799_v45 = vadd.f32 %v1538_v47, %v1501_v32 }
  0xd9   :  { %v1050_v56 = vmax.f32 %v986_v49, 0.0  ;;  %1144 = vst [vmem:[#allocation5 + $0x118] sm:$0xff] %v1080_v51  ;;  %v169_v57 = vpop.f32.mrf.mxu2 }
  0xda   :  { %1113 = vst [vmem:[#allocation5 + $0x20] sm:$0xff] %v1049_v54  ;;  %v953_v59 = vmul.f32 2.0, %v169_v57  ;;  %v282_v60 = vpop.f32.mrf.mxu3 }
  0xdb   :  { %1114 = vst [vmem:[#allocation5 + $0x28] sm:$0xff] %v1050_v56  ;;  %v954_v62 = vmul.f32 2.0, %v282_v60  ;;  %v124_v63 = vpop.f32.mrf.mxu0 }
  0xdc   :  { %v1017_v0 = vsub.f32 %v825_v55, %v953_v59  ;;  %v923_v1 = vmul.f32 2.0, %v124_v63  ;;  %v237_v2 = vpop.f32.mrf.mxu1 }
  0xdd   :  { %v1018_v3 = vsub.f32 %v826_v23, %v954_v62  ;;  %v924_v4 = vmul.f32 2.0, %v237_v2  ;;  %v732_v62 = vpop.permute.xlu0 %731 }
  0xde   :  { %v1081_v5 = vmax.f32 %v1017_v0, 0.0  ;;  %v987_v6 = vsub.f32 %v795_v58, %v923_v1  ;;  %v831_v1 = vadd.f32 %v1538_v47, %v732_v62 }
  0xdf   :  { %v1082_v8 = vmax.f32 %v1018_v3, 0.0  ;;  %v988_v9 = vsub.f32 %v796_v61, %v924_v4  ;;  %v832_v3 = vadd.f32 %v1540_v48, %v732_v62  ;;  %v805_v62 = vadd.f32 %v1538_v47, %v1513_v37 }
  0xe0   :  { %1145 = vst [vmem:[#allocation5 + $0x120] sm:$0xff] %v1081_v5  ;;  %v1051_v11 = vmax.f32 %v987_v6, 0.0 }
  0xe1   :  { %1146 = vst [vmem:[#allocation5 + $0x128] sm:$0xff] %v1082_v8  ;;  %v1052_v28 = vmax.f32 %v988_v9, 0.0  ;;  %v172_v14 = vpop.f32.mrf.mxu2  ;;  %v801_v9 = vadd.f32 %v1538_v47, %v1511_v36 }
  0xe2   :  { %1115 = vst [vmem:[#allocation5 + $0x30] sm:$0xff] %v1051_v11  ;;  %v955_v16 = vmul.f32 2.0, %v172_v14  ;;  %v285_v17 = vpop.f32.mrf.mxu3 }
  0xe3   :  { %1116 = vst [vmem:[#allocation5 + $0x38] sm:$0xff] %v1052_v28  ;;  %v956_v19 = vmul.f32 2.0, %v285_v17  ;;  %v127_v20 = vpop.f32.mrf.mxu0  ;;  %v802_v28 = vadd.f32 %v1540_v48, %v1511_v36 }
  0xe4   :  { %v1019_v21 = vsub.f32 %v827_v10, %v955_v16  ;;  %v925_v22 = vmul.f32 2.0, %v127_v20  ;;  %v240_v24 = vpop.f32.mrf.mxu1 }
  0xe5   :  { %v1020_v25 = vsub.f32 %v828_v13, %v956_v19  ;;  %v926_v26 = vmul.f32 2.0, %v240_v24 }
  0xe6   :  { %v1083_v29 = vmax.f32 %v1019_v21, 0.0  ;;  %v989_v30 = vsub.f32 %v797_v15, %v925_v22  ;;  %v737_v21 = vpop.permute.xlu1 %736 }
  0xe7   :  { %v1084_v31 = vmax.f32 %v1020_v25, 0.0  ;;  %v990_v34 = vsub.f32 %v798_v18, %v926_v26  ;;  %v833_v25 = vadd.f32 %v1538_v47, %v737_v21 }
  0xe8   :  { %1147 = vst [vmem:[#allocation5 + $0x130] sm:$0xff] %v1083_v29  ;;  %v1053_v39 = vmax.f32 %v989_v30, 0.0  ;;  %v834_v30 = vadd.f32 %v1540_v48, %v737_v21  ;;  %v808_v21 = vadd.f32 %v1540_v48, %v1523_v41 }
  0xe9   :  { %1148 = vst [vmem:[#allocation5 + $0x138] sm:$0xff] %v1084_v31  ;;  %v1054_v43 = vmax.f32 %v990_v34, 0.0  ;;  %v175_v44 = vpop.f32.mrf.mxu2  ;;  %v803_v34 = vadd.f32 %v1538_v47, %v1503_v33 }
  0xea   :  { %1117 = vst [vmem:[#allocation5 + $0x40] sm:$0xff] %v1053_v39  ;;  %v957_v49 = vmul.f32 2.0, %v175_v44  ;;  %v288_v51 = vpop.f32.mrf.mxu3 }
  0xeb   :  { %1118 = vst [vmem:[#allocation5 + $0x48] sm:$0xff] %v1054_v43  ;;  %v958_v54 = vmul.f32 2.0, %v288_v51  ;;  %v130_v55 = vpop.f32.mrf.mxu0  ;;  %v804_v43 = vadd.f32 %v1540_v48, %v1503_v33 }
  0xec   :  { %v1021_v56 = vsub.f32 %v829_v40, %v957_v49  ;;  %v927_v23 = vmul.f32 2.0, %v130_v55  ;;  %v243_v57 = vpop.f32.mrf.mxu1  ;;  %v742_v55 = vpop.permute.xlu2 %741 }
  0xed   :  { %v1022_v58 = vsub.f32 %v830_v27, %v958_v54  ;;  %v928_v59 = vmul.f32 2.0, %v243_v57  ;;  %v835_v57 = vadd.f32 %v1538_v47, %v742_v55 }
  0xee   :  { %v1085_v60 = vmax.f32 %v1021_v56, 0.0  ;;  %v991_v61 = vsub.f32 %v799_v45, %v927_v23 }
  0xef   :  { %v1086_v63 = vmax.f32 %v1022_v58, 0.0  ;;  %v992_v0 = vsub.f32 %v800_v52, %v928_v59 }
  0xf0   :  { %1149 = vst [vmem:[#allocation5 + $0x140] sm:$0xff] %v1085_v60  ;;  %v1055_v2 = vmax.f32 %v991_v61, 0.0  ;;  %v836_v60 = vadd.f32 %v1540_v48, %v742_v55 }
  0xf1   :  { %1150 = vst [vmem:[#allocation5 + $0x148] sm:$0xff] %v1086_v63  ;;  %v1056_v32 = vmax.f32 %v992_v0, 0.0  ;;  %v178_v4 = vpop.f32.mrf.mxu2 }
  0xf2   :  { %1119 = vst [vmem:[#allocation5 + $0x50] sm:$0xff] %v1055_v2  ;;  %v959_v5 = vmul.f32 2.0, %v178_v4  ;;  %v291_v6 = vpop.f32.mrf.mxu3  ;;  %v806_v2 = vadd.f32 %v1540_v48, %v1513_v37 }
  0xf3   :  { %1120 = vst [vmem:[#allocation5 + $0x58] sm:$0xff] %v1056_v32  ;;  %v960_v7 = vmul.f32 2.0, %v291_v6  ;;  %v133_v8 = vpop.f32.mrf.mxu0 }
  0xf4   :  { %v1023_v10 = vsub.f32 %v831_v1, %v959_v5  ;;  %v929_v11 = vmul.f32 2.0, %v133_v8  ;;  %v246_v13 = vpop.f32.mrf.mxu1 }
  0xf5   :  { %v1024_v14 = vsub.f32 %v832_v3, %v960_v7  ;;  %v930_v15 = vmul.f32 2.0, %v246_v13 }
  0xf6   :  { %v1087_v16 = vmax.f32 %v1023_v10, 0.0  ;;  %v993_v17 = vsub.f32 %v801_v9, %v929_v11  ;;  %v747_v9 = vpop.permute.xlu0 %746 }
  0xf7   :  { %v1088_v18 = vmax.f32 %v1024_v14, 0.0  ;;  %v994_v19 = vsub.f32 %v802_v28, %v930_v15  ;;  %v837_v13 = vadd.f32 %v1538_v47, %v747_v9  ;;  %v838_v15 = vadd.f32 %v1540_v48, %v747_v9 }
  0xf8   :  { %1151 = vst [vmem:[#allocation5 + $0x150] sm:$0xff] %v1087_v16  ;;  %v1057_v20 = vmax.f32 %v993_v17, 0.0  ;;  %v807_v17 = vadd.f32 %v1538_v47, %v1523_v41 }
  0xf9   :  { %1152 = vst [vmem:[#allocation5 + $0x158] sm:$0xff] %v1088_v18  ;;  %v1058_v22 = vmax.f32 %v994_v19, 0.0  ;;  %v181_v24 = vpop.f32.mrf.mxu2 }
  0xfa   :  { %1121 = vst [vmem:[#allocation5 + $0x60] sm:$0xff] %v1057_v20  ;;  %v961_v26 = vmul.f32 2.0, %v181_v24  ;;  %v294_v29 = vpop.f32.mrf.mxu3 }
  0xfb   :  { %1122 = vst [vmem:[#allocation5 + $0x68] sm:$0xff] %v1058_v22  ;;  %v962_v36 = vmul.f32 2.0, %v294_v29  ;;  %v136_v31 = vpop.f32.mrf.mxu0 }
  0xfc   :  { %v1025_v35 = vsub.f32 %v833_v25, %v961_v26  ;;  %v931_v39 = vmul.f32 2.0, %v136_v31  ;;  %v249_v40 = vpop.f32.mrf.mxu1  ;;  %v752_v31 = vpop.permute.xlu1 %751 }
  0xfd   :  { %v1026_v27 = vsub.f32 %v834_v30, %v962_v36  ;;  %v932_v44 = vmul.f32 2.0, %v249_v40 }
  0xfe   :  { %v1089_v45 = vmax.f32 %v1025_v35, 0.0  ;;  %v995_v49 = vsub.f32 %v803_v34, %v931_v39  ;;  %v839_v39 = vadd.f32 %v1538_v47, %v752_v31 }
  0xff   :  { %v1090_v51 = vmax.f32 %v1026_v27, 0.0  ;;  %v996_v52 = vsub.f32 %v804_v43, %v932_v44  ;;  %v840_v27 = vadd.f32 %v1540_v48, %v752_v31 }
 0x100   :  { %1153 = vst [vmem:[#allocation5 + $0x160] sm:$0xff] %v1089_v45  ;;  %v1059_v54 = vmax.f32 %v995_v49, 0.0  ;;  %v809_v45 = vadd.f32 %v1538_v47, %v1515_v38 }
 0x101   :  { %1154 = vst [vmem:[#allocation5 + $0x168] sm:$0xff] %v1090_v51  ;;  %v1060_v56 = vmax.f32 %v996_v52, 0.0  ;;  %v184_v23 = vpop.f32.mrf.mxu2 }
 0x102   :  { %1123 = vst [vmem:[#allocation5 + $0x70] sm:$0xff] %v1059_v54  ;;  %v963_v58 = vmul.f32 2.0, %v184_v23  ;;  %v297_v59 = vpop.f32.mrf.mxu3  ;;  %v810_v54 = vadd.f32 %v1540_v48, %v1515_v38 }
 0x103   :  { %1124 = vst [vmem:[#allocation5 + $0x78] sm:$0xff] %v1060_v56  ;;  %v964_v33 = vmul.f32 2.0, %v297_v59  ;;  %v139_v61 = vpop.f32.mrf.mxu0 }
 0x104   :  { %v1027_v63 = vsub.f32 %v835_v57, %v963_v58  ;;  %v933_v0 = vmul.f32 2.0, %v139_v61  ;;  %v252_v1 = vpop.f32.mrf.mxu1 }
 0x105   :  { %v1028_v3 = vsub.f32 %v836_v60, %v964_v33  ;;  %v934_v32 = vmul.f32 2.0, %v252_v1  ;;  %v757_v33 = vpop.permute.xlu2 %756 }
 0x106   :  { %v1091_v4 = vmax.f32 %v1027_v63, 0.0  ;;  %v997_v5 = vsub.f32 %v805_v62, %v933_v0  ;;  %v841_v63 = vadd.f32 %v1538_v47, %v757_v33 }
 0x107   :  { %v1092_v6 = vmax.f32 %v1028_v3, 0.0  ;;  %v998_v7 = vsub.f32 %v806_v2, %v934_v32  ;;  %v842_v2 = vadd.f32 %v1540_v48, %v757_v33  ;;  %v811_v32 = vadd.f32 %v1538_v47, %v1525_v42 }
 0x108   :  { %1155 = vst [vmem:[#allocation5 + $0x170] sm:$0xff] %v1091_v4  ;;  %v1061_v8 = vmax.f32 %v997_v5, 0.0 }
 0x109   :  { %1156 = vst [vmem:[#allocation5 + $0x178] sm:$0xff] %v1092_v6  ;;  %v1062_v10 = vmax.f32 %v998_v7, 0.0  ;;  %v187_v11 = vpop.f32.mrf.mxu2  ;;  %v812_v7 = vadd.f32 %v1540_v48, %v1525_v42 }
 0x10a   :  { %1125 = vst [vmem:[#allocation5 + $0x80] sm:$0xff] %v1061_v8  ;;  %v965_v28 = vmul.f32 2.0, %v187_v11  ;;  %v300_v14 = vpop.f32.mrf.mxu3 }
 0x10b   :  { %1126 = vst [vmem:[#allocation5 + $0x88] sm:$0xff] %v1062_v10  ;;  %v966_v37 = vmul.f32 2.0, %v300_v14  ;;  %v142_v16 = vpop.f32.mrf.mxu0 }
 0x10c   :  { %v1029_v18 = vsub.f32 %v837_v13, %v965_v28  ;;  %v935_v19 = vmul.f32 2.0, %v142_v16  ;;  %v255_v20 = vpop.f32.mrf.mxu1 }
 0x10d   :  { %v1030_v22 = vsub.f32 %v838_v15, %v966_v37  ;;  %v936_v24 = vmul.f32 2.0, %v255_v20  ;;  %v762_v15 = vpop.permute.xlu0 %761 }
 0x10e   :  { %v1093_v25 = vmax.f32 %v1029_v18, 0.0  ;;  %v999_v26 = vsub.f32 %v807_v17, %v935_v19  ;;  %v843_v17 = vadd.f32 %v1538_v47, %v762_v15  ;;  %v844_v20 = vadd.f32 %v1540_v48, %v762_v15 }
 0x10f   :  { %v1094_v29 = vmax.f32 %v1030_v22, 0.0  ;;  %v1000_v30 = vsub.f32 %v808_v21, %v936_v24  ;;  %v813_v22 = vadd.f32 %v1538_v47, %v1543_v50 }
 0x110   :  { %1157 = vst [vmem:[#allocation5 + $0x180] sm:$0xff] %v1093_v25  ;;  %v1063_v36 = vmax.f32 %v999_v26, 0.0 }
 0x111   :  { %1158 = vst [vmem:[#allocation5 + $0x188] sm:$0xff] %v1094_v29  ;;  %v1064_v34 = vmax.f32 %v1000_v30, 0.0  ;;  %v190_v35 = vpop.f32.mrf.mxu2  ;;  %v814_v29 = vadd.f32 %v1540_v48, %v1543_v50 }
 0x112   :  { %1127 = vst [vmem:[#allocation5 + $0x90] sm:$0xff] %v1063_v36  ;;  %v967_v40 = vmul.f32 2.0, %v190_v35  ;;  %v303_v43 = vpop.f32.mrf.mxu3 }
 0x113   :  { %1128 = vst [vmem:[#allocation5 + $0x98] sm:$0xff] %v1064_v34  ;;  %v968_v41 = vmul.f32 2.0, %v303_v43  ;;  %v145_v44 = vpop.f32.mrf.mxu0  ;;  %v767_v43 = vpop.permute.xlu1 %766 }
 0x114   :  { %v1031_v49 = vsub.f32 %v839_v39, %v967_v40  ;;  %v937_v51 = vmul.f32 2.0, %v145_v44  ;;  %v258_v52 = vpop.f32.mrf.mxu1  ;;  %v845_v44 = vadd.f32 %v1538_v47, %v767_v43 }
 0x115   :  { %v1032_v55 = vsub.f32 %v840_v27, %v968_v41  ;;  %v938_v56 = vmul.f32 2.0, %v258_v52  ;;  %v777_v15 = vpop.permute.xlu0 %776 }
 0x116   :  { %v1095_v23 = vmax.f32 %v1031_v49, 0.0  ;;  %v1001_v57 = vsub.f32 %v809_v45, %v937_v51  ;;  %v846_v51 = vadd.f32 %v1540_v48, %v767_v43 }
 0x117   :  { %v1096_v58 = vmax.f32 %v1032_v55, 0.0  ;;  %v1002_v59 = vsub.f32 %v810_v54, %v938_v56  ;;  %v815_v54 = vadd.f32 %v1538_v47, %v1536_v46 }
 0x118   :  { %1159 = vst [vmem:[#allocation5 + $0x190] sm:$0xff] %v1095_v23  ;;  %v1065_v60 = vmax.f32 %v1001_v57, 0.0  ;;  %v816_v57 = vadd.f32 %v1540_v48, %v1536_v46 }
 0x119   :  { %1160 = vst [vmem:[#allocation5 + $0x198] sm:$0xff] %v1096_v58  ;;  %v1066_v61 = vmax.f32 %v1002_v59, 0.0  ;;  %v193_v62 = vpop.f32.mrf.mxu2 }
 0x11a   :  { %1129 = vst [vmem:[#allocation5 + $0xa0] sm:$0xff] %v1065_v60  ;;  %v969_v0 = vmul.f32 2.0, %v193_v62  ;;  %v306_v1 = vpop.f32.mrf.mxu3 }
 0x11b   :  { %1130 = vst [vmem:[#allocation5 + $0xa8] sm:$0xff] %v1066_v61  ;;  %v970_v38 = vmul.f32 2.0, %v306_v1  ;;  %v148_v3 = vpop.f32.mrf.mxu0  ;;  %v772_v61 = vpop.permute.xlu2 %771 }
 0x11c   :  { %v1033_v4 = vsub.f32 %v841_v63, %v969_v0  ;;  %v939_v5 = vmul.f32 2.0, %v148_v3  ;;  %v261_v6 = vpop.f32.mrf.mxu1 }
 0x11d   :  { %v1034_v8 = vsub.f32 %v842_v2, %v970_v38  ;;  %v940_v9 = vmul.f32 2.0, %v261_v6  ;;  %v847_v38 = vadd.f32 %v1538_v47, %v772_v61  ;;  %v817_v6 = vadd.f32 %v1538_v47, %v1546_v53 }
 0x11e   :  { %v1097_v10 = vmax.f32 %v1033_v4, 0.0  ;;  %v1003_v11 = vsub.f32 %v811_v32, %v939_v5  ;;  %v848_v4 = vadd.f32 %v1540_v48, %v772_v61 }
 0x11f   :  { %v1098_v13 = vmax.f32 %v1034_v8, 0.0  ;;  %v1004_v28 = vsub.f32 %v812_v7, %v940_v9 }
 0x120   :  { %1161 = vst [vmem:[#allocation5 + $0x1a0] sm:$0xff] %v1097_v10  ;;  %v1067_v14 = vmax.f32 %v1003_v11, 0.0  ;;  %v818_v10 = vadd.f32 %v1540_v48, %v1546_v53 }
 0x121   :  { %1162 = vst [vmem:[#allocation5 + $0x1a8] sm:$0xff] %v1098_v13  ;;  %v1068_v37 = vmax.f32 %v1004_v28, 0.0  ;;  %v196_v16 = vpop.f32.mrf.mxu2 }
 0x122   :  { %1131 = vst [vmem:[#allocation5 + $0xb0] sm:$0xff] %v1067_v14  ;;  %v971_v18 = vmul.f32 2.0, %v196_v16  ;;  %v309_v19 = vpop.f32.mrf.mxu3 }
 0x123   :  { %1132 = vst [vmem:[#allocation5 + $0xb8] sm:$0xff] %v1068_v37  ;;  %v972_v42 = vmul.f32 2.0, %v309_v19  ;;  %v151_v21 = vpop.f32.mrf.mxu0 }
 0x124   :  { %v1035_v24 = vsub.f32 %v843_v17, %v971_v18  ;;  %v941_v25 = vmul.f32 2.0, %v151_v21  ;;  %v264_v26 = vpop.f32.mrf.mxu1 }
 0x125   :  { %v1036_v30 = vsub.f32 %v844_v20, %v972_v42  ;;  %v942_v36 = vmul.f32 2.0, %v264_v26  ;;  %v849_v20 = vadd.f32 %v1538_v47, %v777_v15 }
 0x126   :  { %v1099_v31 = vmax.f32 %v1035_v24, 0.0  ;;  %v1005_v34 = vsub.f32 %v813_v22, %v941_v25  ;;  %v850_v22 = vadd.f32 %v1540_v48, %v777_v15  ;;  %v819_v25 = vadd.f32 %v1538_v47, %v1552_v12 }
 0x127   :  { %v1100_v35 = vmax.f32 %v1036_v30, 0.0  ;;  %v1006_v39 = vsub.f32 %v814_v29, %v942_v36  ;;  %v820_v36 = vadd.f32 %v1540_v48, %v1552_v12 }
 0x128   :  { %1163 = vst [vmem:[#allocation5 + $0x1b0] sm:$0xff] %v1099_v31  ;;  %v1069_v40 = vmax.f32 %v1005_v34, 0.0 }
 0x129   :  { %1164 = vst [vmem:[#allocation5 + $0x1b8] sm:$0xff] %v1100_v35  ;;  %v1070_v27 = vmax.f32 %v1006_v39, 0.0  ;;  %v199_v41 = vpop.f32.mrf.mxu2 }
 0x12a   :  { %1133 = vst [vmem:[#allocation5 + $0xc0] sm:$0xff] %v1069_v40  ;;  %v973_v45 = vmul.f32 2.0, %v199_v41  ;;  %v312_v49 = vpop.f32.mrf.mxu3  ;;  %v782_v40 = vpop.permute.xlu1 %781 }
 0x12b   :  { %1134 = vst [vmem:[#allocation5 + $0xc8] sm:$0xff] %v1070_v27  ;;  %v974_v50 = vmul.f32 2.0, %v312_v49  ;;  %v154_v52 = vpop.f32.mrf.mxu0  ;;  %v851_v49 = vadd.f32 %v1538_v47, %v782_v40 }
 0x12c   :  { %v1037_v55 = vsub.f32 %v845_v44, %v973_v45  ;;  %v943_v56 = vmul.f32 2.0, %v154_v52  ;;  %v267_v23 = vpop.f32.mrf.mxu1  ;;  %v852_v52 = vadd.f32 %v1540_v48, %v782_v40 }
 0x12d   :  { %v1038_v58 = vsub.f32 %v846_v51, %v974_v50  ;;  %v944_v59 = vmul.f32 2.0, %v267_v23 }
 0x12e   :  { %v1101_v60 = vmax.f32 %v1037_v55, 0.0  ;;  %v1007_v33 = vsub.f32 %v815_v54, %v943_v56 }
 0x12f   :  { %v1102_v62 = vmax.f32 %v1038_v58, 0.0  ;;  %v1008_v63 = vsub.f32 %v816_v57, %v944_v59 }
 0x130   :  { %1165 = vst [vmem:[#allocation5 + $0x1c0] sm:$0xff] %v1101_v60  ;;  %v1071_v0 = vmax.f32 %v1007_v33, 0.0 }
 0x131   :  { %1166 = vst [vmem:[#allocation5 + $0x1c8] sm:$0xff] %v1102_v62  ;;  %v1072_v1 = vmax.f32 %v1008_v63, 0.0  ;;  %v202_v2 = vpop.f32.mrf.mxu2 }
 0x132   :  { %1135 = vst [vmem:[#allocation5 + $0xd0] sm:$0xff] %v1071_v0  ;;  %v975_v3 = vmul.f32 2.0, %v202_v2  ;;  %v315_v32 = vpop.f32.mrf.mxu3 }
 0x133   :  { %1136 = vst [vmem:[#allocation5 + $0xd8] sm:$0xff] %v1072_v1  ;;  %v976_v46 = vmul.f32 2.0, %v315_v32  ;;  %v157_v5 = vpop.f32.mrf.mxu0 }
 0x134   :  { %v1039_v7 = vsub.f32 %v847_v38, %v975_v3  ;;  %v945_v8 = vmul.f32 2.0, %v157_v5  ;;  %v270_v9 = vpop.f32.mrf.mxu1 }
 0x135   :  { %v1040_v11 = vsub.f32 %v848_v4, %v976_v46  ;;  %v946_v13 = vmul.f32 2.0, %v270_v9 }
 0x136   :  { %v1103_v28 = vmax.f32 %v1039_v7, 0.0  ;;  %v1009_v14 = vsub.f32 %v817_v6, %v945_v8 }
 0x137   :  { %v1104_v37 = vmax.f32 %v1040_v11, 0.0  ;;  %v1010_v16 = vsub.f32 %v818_v10, %v946_v13 }
 0x138   :  { %1167 = vst [vmem:[#allocation5 + $0x1d0] sm:$0xff] %v1103_v28  ;;  %v1073_v17 = vmax.f32 %v1009_v14, 0.0 }
 0x139   :  { %1168 = vst [vmem:[#allocation5 + $0x1d8] sm:$0xff] %v1104_v37  ;;  %v1074_v18 = vmax.f32 %v1010_v16, 0.0  ;;  %v205_v19 = vpop.f32.mrf.mxu2 }
 0x13a   :  { %1137 = vst [vmem:[#allocation5 + $0xe0] sm:$0xff] %v1073_v17  ;;  %v977_v42 = vmul.f32 2.0, %v205_v19  ;;  %v318_v21 = vpop.f32.mrf.mxu3 }
 0x13b   :  { %1138 = vst [vmem:[#allocation5 + $0xe8] sm:$0xff] %v1074_v18  ;;  %v978_v53 = vmul.f32 2.0, %v318_v21  ;;  %v160_v24 = vpop.f32.mrf.mxu0 }
 0x13c   :  { %v1041_v26 = vsub.f32 %v849_v20, %v977_v42  ;;  %v947_v29 = vmul.f32 2.0, %v160_v24  ;;  %v273_v30 = vpop.f32.mrf.mxu1 }
 0x13d   :  { %v1042_v31 = vsub.f32 %v850_v22, %v978_v53  ;;  %v948_v34 = vmul.f32 2.0, %v273_v30 }
 0x13e   :  { %v1105_v35 = vmax.f32 %v1041_v26, 0.0  ;;  %v1011_v39 = vsub.f32 %v819_v25, %v947_v29 }
 0x13f   :  { %v1106_v43 = vmax.f32 %v1042_v31, 0.0  ;;  %v1012_v27 = vsub.f32 %v820_v36, %v948_v34 }
 0x140   :  { %1169 = vst [vmem:[#allocation5 + $0x1e0] sm:$0xff] %v1105_v35  ;;  %v1075_v41 = vmax.f32 %v1011_v39, 0.0 }
 0x141   :  { %1170 = vst [vmem:[#allocation5 + $0x1e8] sm:$0xff] %v1106_v43  ;;  %v1076_v44 = vmax.f32 %v1012_v27, 0.0  ;;  %v208_v45 = vpop.f32.mrf.mxu2 }
 0x142   :  { %1139 = vst [vmem:[#allocation5 + $0xf0] sm:$0xff] %v1075_v41  ;;  %v979_v51 = vmul.f32 2.0, %v208_v45  ;;  %v321_v50 = vpop.f32.mrf.mxu3 }
 0x143   :  { %1140 = vst [vmem:[#allocation5 + $0xf8] sm:$0xff] %v1076_v44  ;;  %v980_v12 = vmul.f32 2.0, %v321_v50 }
 0x144   :  { %v1043_v54 = vsub.f32 %v851_v49, %v979_v51 }
 0x145   :  { %v1044_v55 = vsub.f32 %v852_v52, %v980_v12 }
 0x146   :  { %v1107_v56 = vmax.f32 %v1043_v54, 0.0 }
 0x147   :  { %v1108_v23 = vmax.f32 %v1044_v55, 0.0 }
 0x148   :  { %1171 = vst [vmem:[#allocation5 + $0x1f0] sm:$0xff] %v1107_v56 }
 0x149   :  { %1172 = vst [vmem:[#allocation5 + $0x1f8] sm:$0xff] %v1108_v23 }
 0x14a   :  { %1185 = dma.vmem_to_hbm [thread:$0]  %s1178_s3, 8192, %s1180_s2, [#allocation4], %s1291_s18, %s1291_s18, %s1292_s19  }
 0x14b   :  { %1284 = dma.done.wait [#allocation4], 8192  }
 0x14c   :  { %1285 = vsyncadd [#allocation4], 4294959104 }
 0x14d   :  { %1190 = vsyncpa [#allocation3], 1 }
 0x14e   :  { %1191 = vsyncpa [#allocation4], 1 }

</bundles_post_ra>
